<compile_context>
chip_gen: v5e
topology: v5e:2x2
jax: 0.10.0
libtpu: 0.0.40
codegen_flags: <defaults>
</compile_context>

<pallas_src>
import functools

import jax
import jax.numpy as jnp
from jax.experimental import pallas as pl
from jax.experimental.pallas import tpu as pltpu

P_DROP = 0.5        # dropout probability p
HIDDEN = 32         # hidden width (module default 10; padded to TPU-friendly 32)
L = 4               # number of ReLU+dropout blocks (1 input block + (L-1) hidden)
BATCH = 8           # base number of input rows
MC_SAMPLES = 16     # Monte-Carlo samples folded into the batch axis
TILE_R = 64         # row tile per grid step (2 steps -> megacore-parallel on v7x)


def bnnet_kernel(x_ref, w_in_ref, b_in_ref, w_hid_ref, b_hid_ref,
                 w_out_t_ref, b_out_ref, bits_ref, o_ref, *, num_hidden, p):
    # keep iff bits < (1-p) * 2^32  (keep probability exactly 1-p)
    keep_thr = jnp.uint32(min(int(round((1.0 - p) * 2.0 ** 32)), 2 ** 32 - 1))
    scale = jnp.float32(1.0 / (1.0 - p))

    def mc_dropout(h, layer):
        keep = bits_ref[layer] < keep_thr          # integer compare, no float convert
        return jnp.where(keep, h * scale, jnp.float32(0.0))

    # Input block: Linear(1, H) as a VPU rank-1 broadcast (skip the K=1 matmul).
    h = x_ref[...] * w_in_ref[...] + b_in_ref[...]        # [R,1]*[1,H] -> [R,H]
    h = jnp.maximum(h, 0.0)
    h = mc_dropout(h, 0)

    # (L-1) hidden blocks: Linear(H, H) on the MXU -> ReLU -> MCDropout(p).
    for i in range(num_hidden):
        h = jnp.dot(h, w_hid_ref[i],
                    preferred_element_type=jnp.float32) + b_hid_ref[i]
        h = jnp.maximum(h, 0.0)
        h = mc_dropout(h, i + 1)

    # Output head: Linear(H, 1) as VPU multiply + XLU lane reduce (skip N=1 matmul).
    o_ref[...] = (jnp.sum(h * w_out_t_ref[...], axis=-1, keepdims=True)
                  + b_out_ref[...])


def bnnet_forward(x, params, dropout_bits, p=P_DROP, tile_r=TILE_R):
    w_in, b_in, w_hid, b_hid, w_out, b_out = params
    R = x.shape[0]
    H = w_in.shape[1]
    num_hidden = w_hid.shape[0]
    n_drop = num_hidden + 1
    w_out_t = w_out.T                                # [1, H], lane-major for the reduce
    assert R % tile_r == 0, (R, tile_r)
    grid = (R // tile_r,)

    kernel = functools.partial(bnnet_kernel, num_hidden=num_hidden, p=p)
    return pl.pallas_call(
        kernel,
        out_shape=jax.ShapeDtypeStruct((R, 1), jnp.float32),
        grid=grid,
        in_specs=[
            pl.BlockSpec((tile_r, 1), lambda i: (i, 0)),                 # x        [R, 1]
            pl.BlockSpec((1, H), lambda i: (0, 0)),                      # w_in     [1, H]
            pl.BlockSpec((1, H), lambda i: (0, 0)),                      # b_in     [1, H]
            pl.BlockSpec((num_hidden, H, H), lambda i: (0, 0, 0)),       # w_hid    [L-1, H, H]
            pl.BlockSpec((num_hidden, 1, H), lambda i: (0, 0, 0)),       # b_hid    [L-1, 1, H]
            pl.BlockSpec((1, H), lambda i: (0, 0)),                      # w_out^T  [1, H]
            pl.BlockSpec((1, 1), lambda i: (0, 0)),                      # b_out    [1, 1]
            pl.BlockSpec((n_drop, tile_r, H), lambda i: (0, i, 0)),      # bits     [L, R, H]
        ],
        out_specs=pl.BlockSpec((tile_r, 1), lambda i: (i, 0)),
        compiler_params=pltpu.CompilerParams(
            dimension_semantics=("parallel",)),
    )(x, w_in, b_in, w_hid, b_hid, w_out_t, b_out, dropout_bits)


def init_params(key, hidden=HIDDEN, num_layers=L):
    """PyTorch-Linear-style init: U(-1/sqrt(fan_in), 1/sqrt(fan_in))."""
    def lin(k, fan_in, fan_out):
        kw, kb = jax.random.split(k)
        bound = 1.0 / jnp.sqrt(jnp.float32(fan_in))
        w = jax.random.uniform(kw, (fan_in, fan_out), jnp.float32, -bound, bound)
        b = jax.random.uniform(kb, (1, fan_out), jnp.float32, -bound, bound)
        return w, b

    keys = jax.random.split(key, num_layers + 1)
    w_in, b_in = lin(keys[0], 1, hidden)
    hid = [lin(keys[i + 1], hidden, hidden) for i in range(num_layers - 1)]
    w_hid = jnp.stack([w for w, _ in hid], axis=0)                 # [L-1, H, H]
    b_hid = jnp.stack([b for _, b in hid], axis=0)                 # [L-1, 1, H]
    w_out, b_out = lin(keys[num_layers], hidden, 1)
    return w_in, b_in, w_hid, b_hid, w_out, b_out


if __name__ == "__main__":
    key = jax.random.PRNGKey(0)
    k_x, k_p, k_d = jax.random.split(key, 3)

    x_base = jax.random.normal(k_x, (BATCH, 1), jnp.float32)       # [N, 1]
    # Amortize MC_SAMPLES Monte-Carlo forward passes into one kernel call by
    # stacking samples along the batch axis (weights shared, masks differ per row).
    x = jnp.tile(x_base, (MC_SAMPLES, 1))                          # [S*N, 1]
    R = x.shape[0]

    params = init_params(k_p, hidden=HIDDEN, num_layers=L)
    # One uint32 per element per dropout layer; compared against (1-p)*2^32 in-kernel.
    dropout_bits = jax.random.bits(k_d, (L, R, HIDDEN), dtype=jnp.uint32)

    out = bnnet_forward(x, params, dropout_bits)
    out = jax.block_until_ready(out)
    assert out.shape == (R, 1), out.shape
    assert bool(jnp.all(jnp.isfinite(out)))
    print("KERNEL_OK")
</pallas_src>

<mosaic_0001>
module attributes {stable_mosaic.version = 11 : i64} {
  func.func @bnnet_kernel(%arg0: i32, %arg1: memref<64x1xf32, #tpu.memory_space<vmem>>, %arg2: memref<1x32xf32, #tpu.memory_space<vmem>>, %arg3: memref<1x32xf32, #tpu.memory_space<vmem>>, %arg4: memref<3x32x32xf32, #tpu.memory_space<vmem>>, %arg5: memref<3x1x32xf32, #tpu.memory_space<vmem>>, %arg6: memref<1x32xf32, #tpu.memory_space<vmem>>, %arg7: memref<1x1xf32, #tpu.memory_space<vmem>>, %arg8: memref<4x64x32xi32, #tpu.memory_space<vmem>>, %arg9: memref<64x1xf32, #tpu.memory_space<vmem>>) attributes {dimension_semantics = [#tpu.dimension_semantics<parallel>], iteration_bounds = array<i64: 2>, scalar_prefetch = 0 : i64, scratch_operands = 0 : i64, tpu.core_type = #tpu.core_type<tc>, window_params = [{transform_indices = @transform_0, window_bounds = array<i64: 64, 1>}, {pipeline_mode = #tpu.pipeline_mode<synchronous>, transform_indices = @transform_1, window_bounds = array<i64: 1, 32>}, {pipeline_mode = #tpu.pipeline_mode<synchronous>, transform_indices = @transform_2, window_bounds = array<i64: 1, 32>}, {pipeline_mode = #tpu.pipeline_mode<synchronous>, transform_indices = @transform_3, window_bounds = array<i64: 3, 32, 32>}, {pipeline_mode = #tpu.pipeline_mode<synchronous>, transform_indices = @transform_4, window_bounds = array<i64: 3, 1, 32>}, {pipeline_mode = #tpu.pipeline_mode<synchronous>, transform_indices = @transform_5, window_bounds = array<i64: 1, 32>}, {pipeline_mode = #tpu.pipeline_mode<synchronous>, transform_indices = @transform_6, window_bounds = array<i64: 1, 1>}, {transform_indices = @transform_7, window_bounds = array<i64: 4, 64, 32>}, {transform_indices = @transform_8, window_bounds = array<i64: 64, 1>}]} {
    %c0 = arith.constant 0 : index
    %c0_0 = arith.constant 0 : index
    %0 = vector.load %arg1[%c0, %c0_0] : memref<64x1xf32, #tpu.memory_space<vmem>>, vector<64x1xf32>
    %c0_1 = arith.constant 0 : index
    %c0_2 = arith.constant 0 : index
    %1 = vector.load %arg2[%c0_1, %c0_2] : memref<1x32xf32, #tpu.memory_space<vmem>>, vector<1x32xf32>
    %2 = vector.broadcast %0 : vector<64x1xf32> to vector<64x32xf32>
    %3 = vector.broadcast %1 : vector<1x32xf32> to vector<64x32xf32>
    %4 = arith.mulf %2, %3 : vector<64x32xf32>
    %c0_3 = arith.constant 0 : index
    %c0_4 = arith.constant 0 : index
    %5 = vector.load %arg3[%c0_3, %c0_4] : memref<1x32xf32, #tpu.memory_space<vmem>>, vector<1x32xf32>
    %6 = vector.broadcast %5 : vector<1x32xf32> to vector<64x32xf32>
    %7 = arith.addf %4, %6 : vector<64x32xf32>
    %cst = arith.constant 0.000000e+00 : f32
    %8 = vector.broadcast %cst : f32 to vector<64x32xf32>
    %9 = arith.maximumf %7, %8 : vector<64x32xf32>
    %c0_5 = arith.constant 0 : index
    %c0_6 = arith.constant 0 : index
    %c0_7 = arith.constant 0 : index
    %10 = vector.load %arg8[%c0_5, %c0_6, %c0_7] : memref<4x64x32xi32, #tpu.memory_space<vmem>>, vector<1x64x32xi32>
    %11 = vector.shape_cast %10 : vector<1x64x32xi32> to vector<64x32xi32>
    %c-2147483648_i32 = arith.constant -2147483648 : i32
    %12 = vector.broadcast %c-2147483648_i32 : i32 to vector<64x32xi32>
    %13 = arith.cmpi ult, %11, %12 : vector<64x32xi32>
    %cst_8 = arith.constant 2.000000e+00 : f32
    %14 = vector.broadcast %cst_8 : f32 to vector<64x32xf32>
    %15 = arith.mulf %9, %14 : vector<64x32xf32>
    %cst_9 = arith.constant 0.000000e+00 : f32
    %16 = vector.broadcast %cst_9 : f32 to vector<64x32xf32>
    %17 = arith.select %13, %15, %16 : vector<64x32xi1>, vector<64x32xf32>
    %c0_10 = arith.constant 0 : index
    %c0_11 = arith.constant 0 : index
    %c0_12 = arith.constant 0 : index
    %18 = vector.load %arg4[%c0_10, %c0_11, %c0_12] : memref<3x32x32xf32, #tpu.memory_space<vmem>>, vector<1x32x32xf32>
    %19 = vector.shape_cast %18 : vector<1x32x32xf32> to vector<32x32xf32>
    %cst_13 = arith.constant dense<0.000000e+00> : vector<64x32xf32>
    %20 = tpu.matmul %17, %19, %cst_13 {dimension_numbers = #tpu.dot_dimension_numbers<[1], [0], [0], [1], [0, 0, 1, 1], [], []>} : vector<64x32xf32>, vector<32x32xf32>, vector<64x32xf32> -> vector<64x32xf32>
    %c0_14 = arith.constant 0 : index
    %c0_15 = arith.constant 0 : index
    %c0_16 = arith.constant 0 : index
    %21 = vector.load %arg5[%c0_14, %c0_15, %c0_16] : memref<3x1x32xf32, #tpu.memory_space<vmem>>, vector<1x1x32xf32>
    %22 = vector.shape_cast %21 : vector<1x1x32xf32> to vector<1x32xf32>
    %23 = vector.broadcast %22 : vector<1x32xf32> to vector<64x32xf32>
    %24 = arith.addf %20, %23 : vector<64x32xf32>
    %cst_17 = arith.constant 0.000000e+00 : f32
    %25 = vector.broadcast %cst_17 : f32 to vector<64x32xf32>
    %26 = arith.maximumf %24, %25 : vector<64x32xf32>
    %c1 = arith.constant 1 : index
    %c0_18 = arith.constant 0 : index
    %c0_19 = arith.constant 0 : index
    %27 = vector.load %arg8[%c1, %c0_18, %c0_19] : memref<4x64x32xi32, #tpu.memory_space<vmem>>, vector<1x64x32xi32>
    %28 = vector.shape_cast %27 : vector<1x64x32xi32> to vector<64x32xi32>
    %c-2147483648_i32_20 = arith.constant -2147483648 : i32
    %29 = vector.broadcast %c-2147483648_i32_20 : i32 to vector<64x32xi32>
    %30 = arith.cmpi ult, %28, %29 : vector<64x32xi32>
    %cst_21 = arith.constant 2.000000e+00 : f32
    %31 = vector.broadcast %cst_21 : f32 to vector<64x32xf32>
    %32 = arith.mulf %26, %31 : vector<64x32xf32>
    %cst_22 = arith.constant 0.000000e+00 : f32
    %33 = vector.broadcast %cst_22 : f32 to vector<64x32xf32>
    %34 = arith.select %30, %32, %33 : vector<64x32xi1>, vector<64x32xf32>
    %c1_23 = arith.constant 1 : index
    %c0_24 = arith.constant 0 : index
    %c0_25 = arith.constant 0 : index
    %35 = vector.load %arg4[%c1_23, %c0_24, %c0_25] : memref<3x32x32xf32, #tpu.memory_space<vmem>>, vector<1x32x32xf32>
    %36 = vector.shape_cast %35 : vector<1x32x32xf32> to vector<32x32xf32>
    %cst_26 = arith.constant dense<0.000000e+00> : vector<64x32xf32>
    %37 = tpu.matmul %34, %36, %cst_26 {dimension_numbers = #tpu.dot_dimension_numbers<[1], [0], [0], [1], [0, 0, 1, 1], [], []>} : vector<64x32xf32>, vector<32x32xf32>, vector<64x32xf32> -> vector<64x32xf32>
    %c1_27 = arith.constant 1 : index
    %c0_28 = arith.constant 0 : index
    %c0_29 = arith.constant 0 : index
    %38 = vector.load %arg5[%c1_27, %c0_28, %c0_29] : memref<3x1x32xf32, #tpu.memory_space<vmem>>, vector<1x1x32xf32>
    %39 = vector.shape_cast %38 : vector<1x1x32xf32> to vector<1x32xf32>
    %40 = vector.broadcast %39 : vector<1x32xf32> to vector<64x32xf32>
    %41 = arith.addf %37, %40 : vector<64x32xf32>
    %cst_30 = arith.constant 0.000000e+00 : f32
    %42 = vector.broadcast %cst_30 : f32 to vector<64x32xf32>
    %43 = arith.maximumf %41, %42 : vector<64x32xf32>
    %c2 = arith.constant 2 : index
    %c0_31 = arith.constant 0 : index
    %c0_32 = arith.constant 0 : index
    %44 = vector.load %arg8[%c2, %c0_31, %c0_32] : memref<4x64x32xi32, #tpu.memory_space<vmem>>, vector<1x64x32xi32>
    %45 = vector.shape_cast %44 : vector<1x64x32xi32> to vector<64x32xi32>
    %c-2147483648_i32_33 = arith.constant -2147483648 : i32
    %46 = vector.broadcast %c-2147483648_i32_33 : i32 to vector<64x32xi32>
    %47 = arith.cmpi ult, %45, %46 : vector<64x32xi32>
    %cst_34 = arith.constant 2.000000e+00 : f32
    %48 = vector.broadcast %cst_34 : f32 to vector<64x32xf32>
    %49 = arith.mulf %43, %48 : vector<64x32xf32>
    %cst_35 = arith.constant 0.000000e+00 : f32
    %50 = vector.broadcast %cst_35 : f32 to vector<64x32xf32>
    %51 = arith.select %47, %49, %50 : vector<64x32xi1>, vector<64x32xf32>
    %c2_36 = arith.constant 2 : index
    %c0_37 = arith.constant 0 : index
    %c0_38 = arith.constant 0 : index
    %52 = vector.load %arg4[%c2_36, %c0_37, %c0_38] : memref<3x32x32xf32, #tpu.memory_space<vmem>>, vector<1x32x32xf32>
    %53 = vector.shape_cast %52 : vector<1x32x32xf32> to vector<32x32xf32>
    %cst_39 = arith.constant dense<0.000000e+00> : vector<64x32xf32>
    %54 = tpu.matmul %51, %53, %cst_39 {dimension_numbers = #tpu.dot_dimension_numbers<[1], [0], [0], [1], [0, 0, 1, 1], [], []>} : vector<64x32xf32>, vector<32x32xf32>, vector<64x32xf32> -> vector<64x32xf32>
    %c2_40 = arith.constant 2 : index
    %c0_41 = arith.constant 0 : index
    %c0_42 = arith.constant 0 : index
    %55 = vector.load %arg5[%c2_40, %c0_41, %c0_42] : memref<3x1x32xf32, #tpu.memory_space<vmem>>, vector<1x1x32xf32>
    %56 = vector.shape_cast %55 : vector<1x1x32xf32> to vector<1x32xf32>
    %57 = vector.broadcast %56 : vector<1x32xf32> to vector<64x32xf32>
    %58 = arith.addf %54, %57 : vector<64x32xf32>
    %cst_43 = arith.constant 0.000000e+00 : f32
    %59 = vector.broadcast %cst_43 : f32 to vector<64x32xf32>
    %60 = arith.maximumf %58, %59 : vector<64x32xf32>
    %c3 = arith.constant 3 : index
    %c0_44 = arith.constant 0 : index
    %c0_45 = arith.constant 0 : index
    %61 = vector.load %arg8[%c3, %c0_44, %c0_45] : memref<4x64x32xi32, #tpu.memory_space<vmem>>, vector<1x64x32xi32>
    %62 = vector.shape_cast %61 : vector<1x64x32xi32> to vector<64x32xi32>
    %c-2147483648_i32_46 = arith.constant -2147483648 : i32
    %63 = vector.broadcast %c-2147483648_i32_46 : i32 to vector<64x32xi32>
    %64 = arith.cmpi ult, %62, %63 : vector<64x32xi32>
    %cst_47 = arith.constant 2.000000e+00 : f32
    %65 = vector.broadcast %cst_47 : f32 to vector<64x32xf32>
    %66 = arith.mulf %60, %65 : vector<64x32xf32>
    %cst_48 = arith.constant 0.000000e+00 : f32
    %67 = vector.broadcast %cst_48 : f32 to vector<64x32xf32>
    %68 = arith.select %64, %66, %67 : vector<64x32xi1>, vector<64x32xf32>
    %c0_49 = arith.constant 0 : index
    %c0_50 = arith.constant 0 : index
    %69 = vector.load %arg6[%c0_49, %c0_50] : memref<1x32xf32, #tpu.memory_space<vmem>>, vector<1x32xf32>
    %70 = vector.broadcast %69 : vector<1x32xf32> to vector<64x32xf32>
    %71 = arith.mulf %68, %70 : vector<64x32xf32>
    %cst_51 = arith.constant dense<0.000000e+00> : vector<64xf32>
    %72 = vector.multi_reduction <add>, %71, %cst_51 [1] : vector<64x32xf32> to vector<64xf32>
    %73 = vector.shape_cast %72 : vector<64xf32> to vector<64x1xf32>
    %c0_52 = arith.constant 0 : index
    %c0_53 = arith.constant 0 : index
    %74 = vector.load %arg7[%c0_52, %c0_53] : memref<1x1xf32, #tpu.memory_space<vmem>>, vector<1x1xf32>
    %75 = vector.broadcast %74 : vector<1x1xf32> to vector<64x1xf32>
    %76 = arith.addf %73, %75 : vector<64x1xf32>
    %c0_54 = arith.constant 0 : index
    %c0_55 = arith.constant 0 : index
    %77 = vector.load %arg9[%c0_54, %c0_55] : memref<64x1xf32, #tpu.memory_space<vmem>>, vector<64x1xf32>
    tpu.vector_store %arg9[%c0_54, %c0_55], %76 {strides = array<i32>} : memref<64x1xf32, #tpu.memory_space<vmem>>, vector<64x1xf32>,
    return
  }
  func.func @transform_0(%arg0: i32) -> (i32, i32) {
    %c0_i32 = arith.constant 0 : i32
    %c0_i32_0 = arith.constant 0 : i32
    return %arg0, %c0_i32 : i32, i32
  }
  func.func @transform_1(%arg0: i32) -> (i32, i32) {
    %c0_i32 = arith.constant 0 : i32
    %c0_i32_0 = arith.constant 0 : i32
    %c0_i32_1 = arith.constant 0 : i32
    return %c0_i32, %c0_i32_0 : i32, i32
  }
  func.func @transform_2(%arg0: i32) -> (i32, i32) {
    %c0_i32 = arith.constant 0 : i32
    %c0_i32_0 = arith.constant 0 : i32
    %c0_i32_1 = arith.constant 0 : i32
    return %c0_i32, %c0_i32_0 : i32, i32
  }
  func.func @transform_3(%arg0: i32) -> (i32, i32, i32) {
    %c0_i32 = arith.constant 0 : i32
    %c0_i32_0 = arith.constant 0 : i32
    %c0_i32_1 = arith.constant 0 : i32
    %c0_i32_2 = arith.constant 0 : i32
    return %c0_i32, %c0_i32_0, %c0_i32_1 : i32, i32, i32
  }
  func.func @transform_4(%arg0: i32) -> (i32, i32, i32) {
    %c0_i32 = arith.constant 0 : i32
    %c0_i32_0 = arith.constant 0 : i32
    %c0_i32_1 = arith.constant 0 : i32
    %c0_i32_2 = arith.constant 0 : i32
    return %c0_i32, %c0_i32_0, %c0_i32_1 : i32, i32, i32
  }
  func.func @transform_5(%arg0: i32) -> (i32, i32) {
    %c0_i32 = arith.constant 0 : i32
    %c0_i32_0 = arith.constant 0 : i32
    %c0_i32_1 = arith.constant 0 : i32
    return %c0_i32, %c0_i32_0 : i32, i32
  }
  func.func @transform_6(%arg0: i32) -> (i32, i32) {
    %c0_i32 = arith.constant 0 : i32
    %c0_i32_0 = arith.constant 0 : i32
    %c0_i32_1 = arith.constant 0 : i32
    return %c0_i32, %c0_i32_0 : i32, i32
  }
  func.func @transform_7(%arg0: i32) -> (i32, i32, i32) {
    %c0_i32 = arith.constant 0 : i32
    %c0_i32_0 = arith.constant 0 : i32
    %c0_i32_1 = arith.constant 0 : i32
    return %c0_i32, %arg0, %c0_i32_0 : i32, i32, i32
  }
  func.func @transform_8(%arg0: i32) -> (i32, i32) {
    %c0_i32 = arith.constant 0 : i32
    %c0_i32_0 = arith.constant 0 : i32
    return %arg0, %c0_i32 : i32, i32
  }
}

</mosaic_0001>

<bundles_post_ra>
// kernel: tpu_custom_call.1
= control target key start
LH: loop header
LB: loop body
LE: loop exit
PB: predicated region body
PF: predicated region fallthrough
CT: control target
= control target key end

     0   :  { %s1690_s0 = inlined_call_operand.vmem [shape: f32[128,1], index: 0, kind: input, shape index: {}]   ;;  %s1691_s1 = inlined_call_operand.vmem [shape: f32[1,32], index: 1, kind: input, shape index: {}]   ;;  %s1692_s2 = inlined_call_operand.vmem [shape: f32[1,32], index: 2, kind: input, shape index: {}]   ;;  %s1693_s3 = inlined_call_operand.vmem [shape: f32[3,32,32], index: 3, kind: input, shape index: {}]   ;;  %s1694_s4 = inlined_call_operand.vmem [shape: f32[3,1,32], index: 4, kind: input, shape index: {}]   ;;  %s1695_s5 = inlined_call_operand.vmem [shape: f32[1,32], index: 5, kind: input, shape index: {}]   ;;  %s1696_s6 = inlined_call_operand.<no memory space> [shape: f32[1,1], index: 6, kind: input, shape index: {}]   ;;  %s1697_s7 = inlined_call_operand.vmem [shape: u32[4,128,32], index: 7, kind: input, shape index: {}]   ;;  %s1698_s8 = inlined_call_operand.vmem [shape: f32[128,1], index: 8, kind: output, shape index: {}]  }
   0x1   :  { %v13_v0 = vstv %s1696_s6 }
   0x2   :  { %14 = vst [vmem:[#allocation2] sm:$0x1] %v13_v0 }
   0x3   :  { %s1372_s29 = smov 0   ;;  %s1374_s30 = smov 0  }
   0x4   :  { %s1376_s9 = smov 0  }
   0x5 LB: > { %s1146_s6 = sadd.s32 4294967295, %s1321_s9   ;;  %s1389_s10 = sadd.s32 1, %s1321_s9   ;;  %s1321_s9 = sphi %s1376_s9, %s1701_s9   ;;  %s1317_s30 = sphi %s1374_s30, %s1700_s30   ;;  %s1313_s29 = sphi %s1372_s29, %s1699_s29  }
   0x6   : > { %s176_s11 = ssub.s32 %s1321_s9, %s1389_s10  ;;  %s179_s12 = sadd.s32 1, %s1317_s30 }
   0x7   : > { %p177_p0 = scmp.eq.s32.totalorder %s176_s11, 0  ;;  %p186_p1 = scmp.ne.s32.totalorder %s1317_s30, %s1313_s29 }
   0x8   : > { %p187_p2 = scmp.eq.s32.totalorder %s1321_s9, 0  ;;  %p1149_p4 = scmp.ge.s32.totalorder %s1321_s9, 2 }
   0x9   : > { %s1398_s13 = scalar_select %p177_p0, %s1317_s30, %s179_s12  }
   0xa   : > { %p188_p3 = por %p187_p2, %p186_p1  ;;  %256 = sbr.rel (%p1149_p4) target bundleno = 51 (0x33), region = 40 }
   0xf   : > { %268 = sbr.rel (!%p188_p3) target bundleno = 51 (0x33), region = 48  ;;  %s270_s14 = sand.u32 (%p188_p3), 1, %s1317_s30  }
  0x10   : > { %s1251_s15 = sshll.u32 (%p188_p3), %s1321_s9, 6  ;;  %s1150_s16 = sshll.u32 (%p188_p3), %s270_s14, 8 }
  0x11   : > { %s1406_s19 = scalar_lea.vmem (%p188_p3), %s1697_s7, %s1251_s15  ;;  %s1411_s20 = scalar_lea.vmem (%p188_p3), [#allocation3], %s1150_s16 }
  0x12   : > { %v366_v1 = vld [vmem:[%s1406_s19] sm:$0xff] (%p188_p3)  ;;  %v368_v2 = vld [vmem:[%s1406_s19 + $0x8] sm:$0xff] (%p188_p3)  ;;  %v370_v3 = vld [vmem:[%s1406_s19 + $0x10] sm:$0xff] (%p188_p3) }
  0x13   : > { %367 = vst [vmem:[%s1411_s20] sm:$0xff] (%p188_p3), %v366_v1  ;;  %v372_v4 = vld [vmem:[%s1406_s19 + $0x18] sm:$0xff] (%p188_p3)  ;;  %v374_v5 = vld [vmem:[%s1406_s19 + $0x20] sm:$0xff] (%p188_p3)  ;;  %v376_v6 = vld [vmem:[%s1406_s19 + $0x28] sm:$0xff] (%p188_p3) }
  0x14   : > { %369 = vst [vmem:[%s1411_s20 + $0x8] sm:$0xff] %v368_v2  ;;  %v378_v7 = vld [vmem:[%s1406_s19 + $0x30] sm:$0xff]  ;;  %v380_v8 = vld [vmem:[%s1406_s19 + $0x38] sm:$0xff]  ;;  %v382_v9 = vld [vmem:[%s1406_s19 + $0x80] sm:$0xff] }
  0x15   : > { %371 = vst [vmem:[%s1411_s20 + $0x10] sm:$0xff] %v370_v3  ;;  %v384_v10 = vld [vmem:[%s1406_s19 + $0x88] sm:$0xff]  ;;  %v386_v11 = vld [vmem:[%s1406_s19 + $0x90] sm:$0xff]  ;;  %v388_v12 = vld [vmem:[%s1406_s19 + $0x98] sm:$0xff] }
  0x16   : > { %373 = vst [vmem:[%s1411_s20 + $0x18] sm:$0xff] %v372_v4  ;;  %v390_v13 = vld [vmem:[%s1406_s19 + $0xa0] sm:$0xff]  ;;  %v392_v14 = vld [vmem:[%s1406_s19 + $0xa8] sm:$0xff]  ;;  %v394_v15 = vld [vmem:[%s1406_s19 + $0xb0] sm:$0xff] }
  0x17   : > { %375 = vst [vmem:[%s1411_s20 + $0x20] sm:$0xff] %v374_v5  ;;  %v396_v16 = vld [vmem:[%s1406_s19 + $0xb8] sm:$0xff]  ;;  %v398_v17 = vld [vmem:[%s1406_s19 + $0x100] sm:$0xff]  ;;  %v400_v18 = vld [vmem:[%s1406_s19 + $0x108] sm:$0xff] }
  0x18   : > { %377 = vst [vmem:[%s1411_s20 + $0x28] sm:$0xff] %v376_v6  ;;  %v402_v19 = vld [vmem:[%s1406_s19 + $0x110] sm:$0xff]  ;;  %v404_v20 = vld [vmem:[%s1406_s19 + $0x118] sm:$0xff]  ;;  %v406_v21 = vld [vmem:[%s1406_s19 + $0x120] sm:$0xff] }
  0x19   : > { %379 = vst [vmem:[%s1411_s20 + $0x30] sm:$0xff] %v378_v7  ;;  %v408_v22 = vld [vmem:[%s1406_s19 + $0x128] sm:$0xff]  ;;  %v410_v23 = vld [vmem:[%s1406_s19 + $0x130] sm:$0xff]  ;;  %v412_v24 = vld [vmem:[%s1406_s19 + $0x138] sm:$0xff] }
  0x1a   : > { %381 = vst [vmem:[%s1411_s20 + $0x38] sm:$0xff] %v380_v8  ;;  %v414_v25 = vld [vmem:[%s1406_s19 + $0x180] sm:$0xff]  ;;  %v416_v26 = vld [vmem:[%s1406_s19 + $0x188] sm:$0xff]  ;;  %v418_v27 = vld [vmem:[%s1406_s19 + $0x190] sm:$0xff] }
  0x1b   : > { %383 = vst [vmem:[%s1411_s20 + $0x40] sm:$0xff] %v382_v9  ;;  %v420_v28 = vld [vmem:[%s1406_s19 + $0x198] sm:$0xff]  ;;  %v422_v29 = vld [vmem:[%s1406_s19 + $0x1a0] sm:$0xff]  ;;  %v424_v30 = vld [vmem:[%s1406_s19 + $0x1a8] sm:$0xff] }
  0x1c   : > { %385 = vst [vmem:[%s1411_s20 + $0x48] sm:$0xff] %v384_v10  ;;  %v426_v31 = vld [vmem:[%s1406_s19 + $0x1b0] sm:$0xff]  ;;  %v428_v32 = vld [vmem:[%s1406_s19 + $0x1b8] sm:$0xff] }
  0x1d   : > { %387 = vst [vmem:[%s1411_s20 + $0x50] sm:$0xff] %v386_v11 }
  0x1e   : > { %389 = vst [vmem:[%s1411_s20 + $0x58] sm:$0xff] %v388_v12 }
  0x1f   : > { %391 = vst [vmem:[%s1411_s20 + $0x60] sm:$0xff] %v390_v13 }
  0x20   : > { %393 = vst [vmem:[%s1411_s20 + $0x68] sm:$0xff] %v392_v14 }
  0x21   : > { %395 = vst [vmem:[%s1411_s20 + $0x70] sm:$0xff] %v394_v15 }
  0x22   : > { %397 = vst [vmem:[%s1411_s20 + $0x78] sm:$0xff] %v396_v16 }
  0x23   : > { %399 = vst [vmem:[%s1411_s20 + $0x80] sm:$0xff] %v398_v17 }
  0x24   : > { %401 = vst [vmem:[%s1411_s20 + $0x88] sm:$0xff] %v400_v18 }
  0x25   : > { %403 = vst [vmem:[%s1411_s20 + $0x90] sm:$0xff] %v402_v19 }
  0x26   : > { %405 = vst [vmem:[%s1411_s20 + $0x98] sm:$0xff] %v404_v20 }
  0x27   : > { %407 = vst [vmem:[%s1411_s20 + $0xa0] sm:$0xff] %v406_v21 }
  0x28   : > { %409 = vst [vmem:[%s1411_s20 + $0xa8] sm:$0xff] %v408_v22 }
  0x29   : > { %411 = vst [vmem:[%s1411_s20 + $0xb0] sm:$0xff] %v410_v23 }
  0x2a   : > { %413 = vst [vmem:[%s1411_s20 + $0xb8] sm:$0xff] %v412_v24 }
  0x2b   : > { %415 = vst [vmem:[%s1411_s20 + $0xc0] sm:$0xff] %v414_v25 }
  0x2c   : > { %417 = vst [vmem:[%s1411_s20 + $0xc8] sm:$0xff] %v416_v26 }
  0x2d   : > { %419 = vst [vmem:[%s1411_s20 + $0xd0] sm:$0xff] %v418_v27 }
  0x2e   : > { %421 = vst [vmem:[%s1411_s20 + $0xd8] sm:$0xff] %v420_v28 }
  0x2f   : > { %423 = vst [vmem:[%s1411_s20 + $0xe0] sm:$0xff] %v422_v29 }
  0x30   : > { %425 = vst [vmem:[%s1411_s20 + $0xe8] sm:$0xff] %v424_v30 }
  0x31   : > { %427 = vst [vmem:[%s1411_s20 + $0xf0] sm:$0xff] %v426_v31 }
  0x32   : > { %429 = vst [vmem:[%s1411_s20 + $0xf8] sm:$0xff] %v428_v32 }
  0x33 PF: > { %p1153_p5 = scmp.ge.s32.totalorder %s1321_s9, 1  ;;  %p434_p6 = scmp.lt.s32.totalorder %s1321_s9, 3 }
  0x35   : > { %p435_p7 = pnand %p1153_p5, %p434_p6 }
  0x36   : > { %s1155_s21 = sshll.u32 (!%p435_p7), %s1146_s6, 3  ;;  %s441_s15 = sand.u32 (!%p435_p7), 1, %s1313_s29  }
  0x37   : > { %438 = sbr.rel (%p435_p7) target bundleno = 756 (0x2f4), region = 86  ;;  %p480_p8 = scmp.lt.s32.totalorder (!%p435_p7), %s1155_s21, 15 }
  0x38   : > { %s1154_s16 = sshll.u32 (!%p435_p7), %s441_s15, 8 }
  0x39   : > { %s1509_s23 = scalar_lea.vmem (!%p435_p7), [#allocation3], %s1154_s16 }
  0x3c   : > { %v1323_v33 = vmov 0   ;;  %s1703_s21 = smov (!%p480_p8, %s1155_s21), 15  ;;  %v623_v42 = vld [vmem:[%s1693_s3 + $0x18] sm:$0xff]  ;;  %v622_v43 = vld [vmem:[%s1693_s3 + $0x10] sm:$0xff]  ;;  %v621_v44 = vld [vmem:[%s1693_s3 + $0x8] sm:$0xff]  ;;  %vm628_vm1 = vcmask 261120  }
  0x3d   : > { %1290 = vset.pattern.permute.xlu1 %v1323_v33  ;;  %1289 = vset.pattern.permute.xlu0 %v1323_v33  ;;  %s1156_s22 = sshll.u32 %s1703_s21, 3  ;;  %v620_v45 = vld [vmem:[%s1693_s3] sm:$0xff]  ;;  %v573_v58 = vld [vmem:[%s1509_s23 + $0x8] sm:$0xff]  ;;  %v578_v60 = vld [vmem:[%s1509_s23 + $0x30] sm:$0xff] }
  0x3e   : > { %1291 = vset.pattern.permute.xlu2 %v1323_v33  ;;  %s483_s25 = scalar_lea.vmem %s1690_s0, %s1156_s22  ;;  %665 = vmatpush.msra.mxu0 %v623_v42  ;;  %v1502_v47 = vld [vmem:[%s1691_s1] ss:$0 sm:$0xff]  ;;  %v572_v49 = vld [vmem:[%s1509_s23] sm:$0xff]  ;;  %v1160_v3 = vxor.u32 2147483648, %v573_v58  ;;  %v1165_v4 = vxor.u32 2147483648, %v578_v60  ;;  %v574_v15 = vld [vmem:[%s1509_s23 + $0x10] sm:$0xff]  ;;  %s490_s11 = scalar_lea.vmem %s1698_s8, %s1156_s22 }
  0x3f   : > { %v494_v34 = vld [vmem:[%s483_s25 + $0x10] sm:$0xff]  ;;  %v492_v35 = vld [vmem:[%s483_s25] sm:$0xff]  ;;  %v495_v36 = vld [vmem:[%s483_s25 + $0x18] sm:$0xff]  ;;  %1252 = vmatpush.msra.mxu3 %v623_v42  ;;  %v1159_v53 = vxor.u32 2147483648, %v572_v49  ;;  %v1161_v21 = vxor.u32 2147483648, %v574_v15 }
  0x40   : > { %513 = vperm.xlu1 %1290, %v494_v34   ;;  %503 = vperm.xlu0 %1289, %v492_v35   ;;  %v498_v37 = vld [vmem:[%s483_s25 + $0x30] sm:$0xff]  ;;  %v493_v38 = vld [vmem:[%s483_s25 + $0x8] sm:$0xff]  ;;  %v499_v39 = vld [vmem:[%s483_s25 + $0x38] sm:$0xff]  ;;  %vm585_vm2 = vcmp.lt.s32.totalorder %v1160_v3, 0  ;;  %vm600_vm3 = vcmp.lt.s32.totalorder %v1165_v4, 0 }
  0x41   : > { %518 = vperm.xlu2 %1291, %v495_v36   ;;  %v497_v40 = vld [vmem:[%s483_s25 + $0x28] sm:$0xff]  ;;  %v496_v41 = vld [vmem:[%s483_s25 + $0x20] sm:$0xff]  ;;  %666 = vmatpush.msra.mxu0 %v622_v43  ;;  %vm582_vm0 = vcmp.lt.s32.totalorder %v1159_v53, 0  ;;  %vm588_vm5 = vcmp.lt.s32.totalorder %v1161_v21, 0  ;;  %v1177_v3 = vld [vmem:[%s1509_s23 + $0x50] sm:$0xff] }
  0x42   : > { %1253 = vmatpush.msra.mxu3 %v622_v43  ;;  %v1507_v48 = vld [vmem:[%s1692_s2] ss:$0 sm:$0xff]  ;;  %v576_v35 = vld [vmem:[%s1509_s23 + $0x20] sm:$0xff]  ;;  %v577_v42 = vld [vmem:[%s1509_s23 + $0x28] sm:$0xff] }
  0x43   : > { %667 = vmatpush.msra.mxu0 %v621_v44  ;;  %v579_v11 = vld [vmem:[%s1509_s23 + $0x38] sm:$0xff]  ;;  %v1175_v53 = vld [vmem:[%s1509_s23 + $0x40] sm:$0xff] }
  0x44   : > { %1254 = vmatpush.msra.mxu3 %v621_v44  ;;  %v1166_v16 = vxor.u32 2147483648, %v579_v11  ;;  %v575_v27 = vld [vmem:[%s1509_s23 + $0x18] sm:$0xff] }
  0x45   : > { %668 = vmatpush.msra.mxu0 %v620_v45  ;;  %v1162_v31 = vxor.u32 2147483648, %v575_v27 }
  0x46   : > { %1255 = vmatpush.msra.mxu3 %v620_v45  ;;  %vm603_vm4 = vcmp.lt.s32.totalorder %v1166_v16, 0  ;;  %v1164_v45 = vxor.u32 2147483648, %v577_v42 }
  0x47   : > { %vm591_vm6 = vcmp.lt.s32.totalorder %v1162_v31, 0 }
  0x48   : > { %533 = vperm.xlu1 %1290, %v498_v37   ;;  %508 = vperm.xlu0 %1289, %v493_v38   ;;  %vm597_vm8 = vcmp.lt.s32.totalorder %v1164_v45, 0  ;;  %v1223_v45 = vld [vmem:[%s1693_s3 + $0x58] sm:$0xff] }
  0x49   : > { %538 = vperm.xlu2 %1291, %v499_v39   ;;  %v1163_v39 = vxor.u32 2147483648, %v576_v35  ;;  %929 = vmatpush.msra.mxu2 %v1223_v45 }
  0x4b   : > { %vm594_vm7 = vcmp.lt.s32.totalorder %v1163_v39, 0 }
  0x50   : > { %528 = vperm.xlu1 %1290, %v497_v40   ;;  %523 = vperm.xlu0 %1289, %v496_v41  }
  0x9b   : > { %v519_v46 = vpop.permute.xlu2 %518 }
  0x9c   : > { %v547_v18 = vmul.f32 %v1502_v47, %v519_v46 }
  0x9e   : > { %v559_v24 = vadd.f32 %v1507_v48, %v547_v18 }
  0xa0   : > { %v567_v28 = vmax.f32 %v559_v24, 0.0 }
  0xa2   : > { %v607_v32 = vmul.f32 2.0, %v567_v28 }
  0xa3   : > { %v539_v55 = vpop.permute.xlu2 %538 }
  0xa4   : > { %v551_v59 = vmul.f32 %v1502_v47, %v539_v55  ;;  %v615_v38 = vsel %vm591_vm6, %v607_v32, 0.0  ;;  %v1183_v55 = vxor.u32 2147483648, %v1175_v53 }
  0xa6   : > { %v563_v7 = vadd.f32 %v1507_v48, %v551_v59  ;;  %vm713_vm9 = vcmp.lt.s32.totalorder %v1183_v55, 0  ;;  %v1176_v59 = vld [vmem:[%s1509_s23 + $0x48] sm:$0xff] }
  0xa8   : > { %v571_v14 = vmax.f32 %v563_v7, 0.0 }
  0xaa   : > { %v611_v22 = vmul.f32 2.0, %v571_v14  ;;  %v1182_v14 = vld [vmem:[%s1509_s23 + $0x78] sm:$0xff] }
  0xac   : > { %v619_v26 = vsel %vm603_vm4, %v611_v22, 0.0 }
  0xb2   : > { %v514_v50 = vpop.permute.xlu1 %513  ;;  %v504_v51 = vpop.permute.xlu0 %503 }
  0xb3   : > { %v544_v52 = vmul.f32 %v1502_v47, %v504_v51  ;;  %v546_v63 = vmul.f32 %v1502_v47, %v514_v50  ;;  %v1192_v50 = vld [vmem:[%s1693_s3 + $0x28] sm:$0xff]  ;;  %v1191_v51 = vld [vmem:[%s1693_s3 + $0x20] sm:$0xff] }
  0xb5   : > { %v556_v54 = vadd.f32 %v1507_v48, %v544_v52  ;;  %v558_v8 = vadd.f32 %v1507_v48, %v546_v63  ;;  %v1558_v52 = vld [vmem:[%s1694_s4] ss:$0 sm:$0xff] }
  0xb7   : > { %v564_v56 = vmax.f32 %v556_v54, 0.0  ;;  %v566_v17 = vmax.f32 %v558_v8, 0.0 }
  0xb9   : > { %v604_v57 = vmul.f32 2.0, %v564_v56  ;;  %v606_v23 = vmul.f32 2.0, %v566_v17  ;;  %v1178_v17 = vld [vmem:[%s1509_s23 + $0x58] sm:$0xff] }
  0xba   : > { %v534_v61 = vpop.permute.xlu1 %533  ;;  %v509_v62 = vpop.permute.xlu0 %508 }
  0xbb   : > { %v550_v0 = vmul.f32 %v1502_v47, %v534_v61  ;;  %v545_v1 = vmul.f32 %v1502_v47, %v509_v62  ;;  %v612_v2 = vsel %vm582_vm0, %v604_v57, 0.0  ;;  %v614_v30 = vsel %vm588_vm5, %v606_v23, 0.0 }
  0xbc   : > { %1167 = vmatmul.msk.f32.vlgmr.msra.gmra.mxu0 %vm628_vm1, %v612_v2  ;;  %v1184_v62 = vxor.u32 2147483648, %v1176_v59  ;;  %v1186_v23 = vxor.u32 2147483648, %v1178_v17  ;;  %v1211_v17 = vld [vmem:[%s1509_s23 + $0xb8] sm:$0xff] }
  0xbd   : > { %v562_v5 = vadd.f32 %v1507_v48, %v550_v0  ;;  %v557_v6 = vadd.f32 %v1507_v48, %v545_v1  ;;  %v1181_v1 = vld [vmem:[%s1509_s23 + $0x70] sm:$0xff] }
  0xbe   : > { %vm716_vm10 = vcmp.lt.s32.totalorder %v1184_v62, 0  ;;  %vm722_vm14 = vcmp.lt.s32.totalorder %v1186_v23, 0 }
  0xbf   : > { %v570_v9 = vmax.f32 %v562_v5, 0.0  ;;  %v565_v10 = vmax.f32 %v557_v6, 0.0  ;;  %v1189_v5 = vxor.u32 2147483648, %v1181_v1 }
  0xc1   : > { %v610_v12 = vmul.f32 2.0, %v570_v9  ;;  %v605_v13 = vmul.f32 2.0, %v565_v10  ;;  %v1185_v9 = vxor.u32 2147483648, %v1177_v3  ;;  %vm731_vm11 = vcmp.lt.s32.totalorder %v1189_v5, 0 }
  0xc2   : > { %v524_v25 = vpop.permute.xlu0 %523  ;;  %v529_v34 = vpop.permute.xlu1 %528 }
  0xc3   : > { %v613_v19 = vsel %vm585_vm2, %v605_v13, 0.0  ;;  %v618_v20 = vsel %vm600_vm3, %v610_v12, 0.0  ;;  %v548_v29 = vmul.f32 %v1502_v47, %v524_v25  ;;  %v549_v36 = vmul.f32 %v1502_v47, %v529_v34  ;;  %v1194_v47 = vld [vmem:[%s1693_s3 + $0x38] sm:$0xff] }
  0xc4   : > { %1168 = vmatmul.msk.f32.gmra.mxu0 %vm628_vm1, %v613_v19  ;;  %1173 = vmatmul.msk.f32.vlgmr.msra.gmra.mxu3 %vm628_vm1, %v618_v20  ;;  %vm719_vm12 = vcmp.lt.s32.totalorder %v1185_v9, 0  ;;  %v1190_v19 = vxor.u32 2147483648, %v1182_v14 }
  0xc5   : > { %v560_v33 = vadd.f32 %v1507_v48, %v548_v29  ;;  %v561_v40 = vadd.f32 %v1507_v48, %v549_v36  ;;  %797 = vmatpush.msra.mxu1 %v1194_v47  ;;  %1256 = vmatpush.msrb.mxu3 %v1194_v47  ;;  %v1193_v48 = vld [vmem:[%s1693_s3 + $0x30] sm:$0xff]  ;;  %v1220_v47 = vld [vmem:[%s1693_s3 + $0x40] sm:$0xff] }
  0xc6   : > { %vm734_vm13 = vcmp.lt.s32.totalorder %v1190_v19, 0 }
  0xc7   : > { %v568_v37 = vmax.f32 %v560_v33, 0.0  ;;  %v569_v43 = vmax.f32 %v561_v40, 0.0  ;;  %798 = vmatpush.msra.mxu1 %v1193_v48  ;;  %1257 = vmatpush.msrb.mxu3 %v1193_v48  ;;  %v1599_v48 = vld [vmem:[%s1694_s4 + $0x1] ss:$0 sm:$0xff] }
  0xc9   : > { %v608_v41 = vmul.f32 2.0, %v568_v37  ;;  %v609_v46 = vmul.f32 2.0, %v569_v43  ;;  %799 = vmatpush.msra.mxu1 %v1192_v50  ;;  %1258 = vmatpush.msrb.mxu3 %v1192_v50  ;;  %v1180_v37 = vld [vmem:[%s1509_s23 + $0x68] sm:$0xff]  ;;  %v1204_v50 = vld [vmem:[%s1509_s23 + $0x80] sm:$0xff] }
  0xca   : > { %v1188_v40 = vxor.u32 2147483648, %v1180_v37 }
  0xcb   : > { %v616_v44 = vsel %vm594_vm7, %v608_v41, 0.0  ;;  %v617_v49 = vsel %vm597_vm8, %v609_v46, 0.0  ;;  %800 = vmatpush.msra.mxu1 %v1191_v51  ;;  %1259 = vmatpush.msrb.mxu3 %v1191_v51  ;;  %v1222_v46 = vld [vmem:[%s1693_s3 + $0x50] sm:$0xff] }
  0xcc   : > { %1169 = vmatmul.msk.f32.gmra.mxu0 %vm628_vm1, %v614_v30  ;;  %1174 = vmatmul.msk.f32.gmra.mxu3 %vm628_vm1, %v619_v26  ;;  %v1179_v30 = vld [vmem:[%s1509_s23 + $0x60] sm:$0xff]  ;;  %vm728_vm0 = vcmp.lt.s32.totalorder %v1188_v40, 0 }
  0xcd   : > { %v1187_v33 = vxor.u32 2147483648, %v1179_v30  ;;  %1260 = vmatpush.msra.mxu3 %v1223_v45  ;;  %930 = vmatpush.msra.mxu2 %v1222_v46 }
  0xcf   : > { %vm725_vm15 = vcmp.lt.s32.totalorder %v1187_v33, 0  ;;  %1261 = vmatpush.msra.mxu3 %v1222_v46 }
  0xd4   : > { %1170 = vmatmul.msk.f32.gmra.mxu0 %vm628_vm1, %v615_v38 }
  0xdc   : > { %1171 = vmatmul.msk.f32.gmra.mxu0 %vm628_vm1, %v616_v44 }
  0xe4   : > { %1172 = vmatmul.msk.f32.gmra.mxu0 %vm628_vm1, %v617_v49  ;;  %v1221_v49 = vld [vmem:[%s1693_s3 + $0x48] sm:$0xff] }
  0xe5   : > { %931 = vmatpush.msra.mxu2 %v1221_v49  ;;  %1262 = vmatpush.msra.mxu3 %v1221_v49 }
  0xe7   : > { %932 = vmatpush.msra.mxu2 %v1220_v47  ;;  %1263 = vmatpush.msra.mxu3 %v1220_v47  ;;  %v1635_v47 = vld [vmem:[%s1695_s5] ss:$0 sm:$0xff] }
 0x139   : > { %v670_v54 = vpop.f32.mrf.mxu0 }
 0x13a   : > { %v671_v56 = vadd.f32 %v1558_v52, %v670_v54 }
 0x13c   : > { %v694_v57 = vmax.f32 %v671_v56, 0.0  ;;  %v1205_v56 = vld [vmem:[%s1509_s23 + $0x88] sm:$0xff] }
 0x13d   : > { %v1213_v59 = vxor.u32 2147483648, %v1205_v56 }
 0x13e   : > { %v735_v58 = vmul.f32 2.0, %v694_v57 }
 0x13f   : > { %vm848_vm3 = vcmp.lt.s32.totalorder %v1213_v59, 0  ;;  %v1235_v59 = vld [vmem:[%s1509_s23 + $0xd0] sm:$0xff] }
 0x140   : > { %v743_v60 = vsel %vm713_vm9, %v735_v58, 0.0 }
 0x141   : > { %v673_v61 = vpop.f32.mrf.mxu0  ;;  %1196 = vmatmul.msk.f32.vlgmr.msra.gmra.mxu1 %vm628_vm1, %v743_v60 }
 0x142   : > { %v674_v63 = vadd.f32 %v1558_v52, %v673_v61 }
 0x144   : > { %v695_v0 = vmax.f32 %v674_v63, 0.0  ;;  %v1206_v63 = vld [vmem:[%s1509_s23 + $0x90] sm:$0xff] }
 0x146   : > { %v736_v2 = vmul.f32 2.0, %v695_v0 }
 0x147   : > { %v688_v4 = vpop.f32.mrf.mxu3 }
 0x148   : > { %v744_v6 = vsel %vm716_vm10, %v736_v2, 0.0  ;;  %v689_v7 = vadd.f32 %v1558_v52, %v688_v4  ;;  %v1214_v2 = vxor.u32 2147483648, %v1206_v63  ;;  %v1210_v4 = vld [vmem:[%s1509_s23 + $0xb0] sm:$0xff]  ;;  %v1243_v63 = vxor.u32 2147483648, %v1235_v59 }
 0x149   : > { %v676_v8 = vpop.f32.mrf.mxu0  ;;  %1197 = vmatmul.msk.f32.gmra.mxu1 %vm628_vm1, %v744_v6 }
 0x14a   : > { %v677_v10 = vadd.f32 %v1558_v52, %v676_v8  ;;  %v700_v11 = vmax.f32 %v689_v7, 0.0  ;;  %v1218_v7 = vxor.u32 2147483648, %v1210_v4  ;;  %vm851_vm4 = vcmp.lt.s32.totalorder %v1214_v2, 0 }
 0x14c   : > { %v696_v12 = vmax.f32 %v677_v10, 0.0  ;;  %v741_v13 = vmul.f32 2.0, %v700_v11  ;;  %v1207_v10 = vld [vmem:[%s1509_s23 + $0x98] sm:$0xff]  ;;  %vm863_vm5 = vcmp.lt.s32.totalorder %v1218_v7, 0 }
 0x14d   : > { %v1215_v14 = vxor.u32 2147483648, %v1207_v10 }
 0x14e   : > { %v737_v15 = vmul.f32 2.0, %v696_v12  ;;  %v749_v16 = vsel %vm731_vm11, %v741_v13, 0.0 }
 0x14f   : > { %v691_v18 = vpop.f32.mrf.mxu3  ;;  %1202 = vmatmul.msk.f32.vlgmr.msrb.gmra.mxu3 %vm628_vm1, %v749_v16  ;;  %vm854_vm6 = vcmp.lt.s32.totalorder %v1215_v14, 0 }
 0x150   : > { %v745_v20 = vsel %vm719_vm12, %v737_v15, 0.0  ;;  %v692_v21 = vadd.f32 %v1558_v52, %v691_v18  ;;  %vm983_vm12 = vcmp.lt.s32.totalorder %v1243_v63, 0 }
 0x151   : > { %v679_v22 = vpop.f32.mrf.mxu0  ;;  %1198 = vmatmul.msk.f32.gmra.mxu1 %vm628_vm1, %v745_v20 }
 0x152   : > { %v680_v24 = vadd.f32 %v1558_v52, %v679_v22  ;;  %v701_v25 = vmax.f32 %v692_v21, 0.0  ;;  %v1219_v21 = vxor.u32 2147483648, %v1211_v17 }
 0x154   : > { %v697_v26 = vmax.f32 %v680_v24, 0.0  ;;  %v742_v27 = vmul.f32 2.0, %v701_v25  ;;  %v1208_v24 = vld [vmem:[%s1509_s23 + $0xa0] sm:$0xff]  ;;  %vm866_vm7 = vcmp.lt.s32.totalorder %v1219_v21, 0 }
 0x156   : > { %v738_v28 = vmul.f32 2.0, %v697_v26  ;;  %v750_v29 = vsel %vm734_vm13, %v742_v27, 0.0 }
 0x157   : > { %1203 = vmatmul.msk.f32.gmra.mxu3 %vm628_vm1, %v750_v29 }
 0x158   : > { %v746_v31 = vsel %vm722_vm14, %v738_v28, 0.0  ;;  %v1216_v28 = vxor.u32 2147483648, %v1208_v24 }
 0x159   : > { %v682_v32 = vpop.f32.mrf.mxu0  ;;  %1199 = vmatmul.msk.f32.gmra.mxu1 %vm628_vm1, %v746_v31 }
 0x15a   : > { %v683_v34 = vadd.f32 %v1558_v52, %v682_v32  ;;  %vm857_vm8 = vcmp.lt.s32.totalorder %v1216_v28, 0 }
 0x15c   : > { %v698_v35 = vmax.f32 %v683_v34, 0.0  ;;  %v1209_v34 = vld [vmem:[%s1509_s23 + $0xa8] sm:$0xff] }
 0x15d   : > { %v1217_v37 = vxor.u32 2147483648, %v1209_v34 }
 0x15e   : > { %v739_v36 = vmul.f32 2.0, %v698_v35 }
 0x15f   : > { %vm860_vm9 = vcmp.lt.s32.totalorder %v1217_v37, 0 }
 0x160   : > { %v747_v38 = vsel %vm725_vm15, %v739_v36, 0.0 }
 0x161   : > { %v685_v39 = vpop.f32.mrf.mxu0  ;;  %1200 = vmatmul.msk.f32.gmra.mxu1 %vm628_vm1, %v747_v38 }
 0x162   : > { %v686_v41 = vadd.f32 %v1558_v52, %v685_v39  ;;  %v1212_v52 = vxor.u32 2147483648, %v1204_v50  ;;  %v1234_v50 = vld [vmem:[%s1509_s23 + $0xc8] sm:$0xff] }
 0x164   : > { %v699_v42 = vmax.f32 %v686_v41, 0.0  ;;  %vm845_vm2 = vcmp.lt.s32.totalorder %v1212_v52, 0 }
 0x166   : > { %v740_v43 = vmul.f32 2.0, %v699_v42  ;;  %v1628_v42 = vld [vmem:[%s1694_s4 + $0x2] ss:$0 sm:$0xff] }
 0x168   : > { %v748_v44 = vsel %vm728_vm0, %v740_v43, 0.0  ;;  %v1233_v43 = vld [vmem:[%s1509_s23 + $0xc0] sm:$0xff] }
 0x169   : > { %1201 = vmatmul.msk.f32.gmra.mxu1 %vm628_vm1, %v748_v44  ;;  %v1241_v45 = vxor.u32 2147483648, %v1233_v43 }
 0x16b   : > { %vm977_vm10 = vcmp.lt.s32.totalorder %v1241_v45, 0 }
 0x1be   : > { %v802_v51 = vpop.f32.mrf.mxu1 }
 0x1bf   : > { %v803_v53 = vadd.f32 %v1599_v48, %v802_v51 }
 0x1c1   : > { %v826_v54 = vmax.f32 %v803_v53, 0.0 }
 0x1c3   : > { %v867_v55 = vmul.f32 2.0, %v826_v54  ;;  %v1242_v54 = vxor.u32 2147483648, %v1234_v50 }
 0x1c5   : > { %v875_v57 = vsel %vm845_vm2, %v867_v55, 0.0  ;;  %vm980_vm11 = vcmp.lt.s32.totalorder %v1242_v54, 0  ;;  %v1298_v54 = vld [vmem:[#allocation2] ss:$0 sm:$0xff] }
 0x1c6   : > { %v805_v58 = vpop.f32.mrf.mxu1  ;;  %1225 = vmatmul.msk.f32.vlgmr.msra.gmra.mxu2 %vm628_vm1, %v875_v57 }
 0x1c7   : > { %v806_v60 = vadd.f32 %v1599_v48, %v805_v58 }
 0x1c9   : > { %v827_v61 = vmax.f32 %v806_v60, 0.0 }
 0x1cb   : > { %v868_v62 = vmul.f32 2.0, %v827_v61 }
 0x1cd   : > { %v876_v0 = vsel %vm848_vm3, %v868_v62, 0.0  ;;  %vm1063_vm3 = vcmask 7168  }
 0x1ce   : > { %v808_v1 = vpop.f32.mrf.mxu1  ;;  %1226 = vmatmul.msk.f32.gmra.mxu2 %vm628_vm1, %v876_v0 }
 0x1cf   : > { %v809_v3 = vadd.f32 %v1599_v48, %v808_v1  ;;  %v1239_v1 = vld [vmem:[%s1509_s23 + $0xf0] sm:$0xff] }
 0x1d1   : > { %v828_v5 = vmax.f32 %v809_v3, 0.0 }
 0x1d2   : > { %v820_v6 = vpop.f32.mrf.mxu3 }
 0x1d3   : > { %v869_v8 = vmul.f32 2.0, %v828_v5  ;;  %v821_v9 = vadd.f32 %v1599_v48, %v820_v6  ;;  %v1247_v5 = vxor.u32 2147483648, %v1239_v1 }
 0x1d5   : > { %v832_v11 = vmax.f32 %v821_v9, 0.0  ;;  %v877_v12 = vsel %vm851_vm4, %v869_v8, 0.0  ;;  %v1236_v8 = vld [vmem:[%s1509_s23 + $0xd8] sm:$0xff]  ;;  %vm995_vm13 = vcmp.lt.s32.totalorder %v1247_v5, 0 }
 0x1d6   : > { %v811_v13 = vpop.f32.mrf.mxu1  ;;  %1227 = vmatmul.msk.f32.gmra.mxu2 %vm628_vm1, %v877_v12 }
 0x1d7   : > { %v812_v15 = vadd.f32 %v1599_v48, %v811_v13  ;;  %v873_v16 = vmul.f32 2.0, %v832_v11  ;;  %v1244_v13 = vxor.u32 2147483648, %v1236_v8 }
 0x1d9   : > { %v829_v18 = vmax.f32 %v812_v15, 0.0  ;;  %v881_v19 = vsel %vm863_vm5, %v873_v16, 0.0  ;;  %vm986_vm14 = vcmp.lt.s32.totalorder %v1244_v13, 0 }
 0x1da   : > { %v823_v20 = vpop.f32.mrf.mxu3  ;;  %1231 = vmatmul.msk.f32.vlgmr.msra.gmra.mxu3 %vm628_vm1, %v881_v19 }
 0x1db   : > { %v870_v22 = vmul.f32 2.0, %v829_v18  ;;  %v824_v23 = vadd.f32 %v1599_v48, %v823_v20 }
 0x1dd   : > { %v833_v25 = vmax.f32 %v824_v23, 0.0  ;;  %v878_v26 = vsel %vm854_vm6, %v870_v22, 0.0  ;;  %v1237_v22 = vld [vmem:[%s1509_s23 + $0xe0] sm:$0xff] }
 0x1de   : > { %v814_v27 = vpop.f32.mrf.mxu1  ;;  %1228 = vmatmul.msk.f32.gmra.mxu2 %vm628_vm1, %v878_v26  ;;  %v1245_v28 = vxor.u32 2147483648, %v1237_v22 }
 0x1df   : > { %v815_v29 = vadd.f32 %v1599_v48, %v814_v27  ;;  %v874_v30 = vmul.f32 2.0, %v833_v25 }
 0x1e0   : > { %vm989_vm15 = vcmp.lt.s32.totalorder %v1245_v28, 0 }
 0x1e1   : > { %v830_v31 = vmax.f32 %v815_v29, 0.0  ;;  %v882_v32 = vsel %vm866_vm7, %v874_v30, 0.0  ;;  %v1240_v30 = vld [vmem:[%s1509_s23 + $0xf8] sm:$0xff] }
 0x1e2   : > { %1232 = vmatmul.msk.f32.gmra.mxu3 %vm628_vm1, %v882_v32  ;;  %v1248_v34 = vxor.u32 2147483648, %v1240_v30 }
 0x1e3   : > { %v871_v33 = vmul.f32 2.0, %v830_v31 }
 0x1e4   : > { %vm998_vm0 = vcmp.lt.s32.totalorder %v1248_v34, 0 }
 0x1e5   : > { %v879_v35 = vsel %vm857_vm8, %v871_v33, 0.0 }
 0x1e6   : > { %v817_v36 = vpop.f32.mrf.mxu1  ;;  %1229 = vmatmul.msk.f32.gmra.mxu2 %vm628_vm1, %v879_v35 }
 0x1e7   : > { %v818_v38 = vadd.f32 %v1599_v48, %v817_v36  ;;  %v1238_v36 = vld [vmem:[%s1509_s23 + $0xe8] sm:$0xff] }
 0x1e9   : > { %v831_v39 = vmax.f32 %v818_v38, 0.0 }
 0x1eb   : > { %v872_v40 = vmul.f32 2.0, %v831_v39 }
 0x1ed   : > { %v880_v41 = vsel %vm860_vm9, %v872_v40, 0.0 }
 0x1ee   : > { %1230 = vmatmul.msk.f32.gmra.mxu2 %vm628_vm1, %v880_v41  ;;  %v1246_v41 = vxor.u32 2147483648, %v1238_v36 }
 0x1f0   : > { %vm992_vm2 = vcmp.lt.s32.totalorder %v1246_v41, 0 }
 0x249   : > { %v934_v44 = vpop.f32.mrf.mxu2 }
 0x24a   : > { %v935_v46 = vadd.f32 %v1628_v42, %v934_v44 }
 0x24c   : > { %v958_v49 = vmax.f32 %v935_v46, 0.0 }
 0x24e   : > { %v999_v48 = vmul.f32 2.0, %v958_v49 }
 0x250   : > { %v1007_v51 = vsel %vm977_vm10, %v999_v48, 0.0 }
 0x251   : > { %v937_v52 = vpop.f32.mrf.mxu2  ;;  %v1019_v53 = vmul.f32 %v1635_v47, %v1007_v51 }
 0x252   : > { %v938_v55 = vadd.f32 %v1628_v42, %v937_v52 }
 0x253   : > { %v1027_v56 = vsel %vm628_vm1, %v1019_v53, 0.0 }
 0x254   : > { %v959_v57 = vmax.f32 %v938_v55, 0.0  ;;  %1028 = vadd.xlane.f32.xlu2 %v1027_v56 }
 0x256   : > { %v1000_v58 = vmul.f32 2.0, %v959_v57 }
 0x258   : > { %v1008_v60 = vsel %vm980_vm11, %v1000_v58, 0.0 }
 0x259   : > { %v940_v61 = vpop.f32.mrf.mxu2  ;;  %v1020_v62 = vmul.f32 %v1635_v47, %v1008_v60 }
 0x25a   : > { %v941_v0 = vadd.f32 %v1628_v42, %v940_v61 }
 0x25b   : > { %v1030_v2 = vsel %vm628_vm1, %v1020_v62, 0.0 }
 0x25c   : > { %v960_v3 = vmax.f32 %v941_v0, 0.0  ;;  %1031 = vadd.xlane.f32.xlu0 %v1030_v2 }
 0x25d   : > { %v952_v4 = vpop.f32.mrf.mxu3 }
 0x25e   : > { %v1001_v6 = vmul.f32 2.0, %v960_v3  ;;  %v953_v7 = vadd.f32 %v1628_v42, %v952_v4 }
 0x260   : > { %v964_v9 = vmax.f32 %v953_v7, 0.0  ;;  %v1009_v10 = vsel %vm983_vm12, %v1001_v6, 0.0 }
 0x261   : > { %v943_v11 = vpop.f32.mrf.mxu2  ;;  %v1021_v12 = vmul.f32 %v1635_v47, %v1009_v10 }
 0x262   : > { %v944_v14 = vadd.f32 %v1628_v42, %v943_v11  ;;  %v1005_v15 = vmul.f32 2.0, %v964_v9 }
 0x263   : > { %v1033_v16 = vsel %vm628_vm1, %v1021_v12, 0.0 }
 0x264   : > { %v961_v17 = vmax.f32 %v944_v14, 0.0  ;;  %1034 = vadd.xlane.f32.xlu1 %v1033_v16  ;;  %v1013_v18 = vsel %vm995_vm13, %v1005_v15, 0.0 }
 0x265   : > { %v955_v19 = vpop.f32.mrf.mxu3  ;;  %v1025_v20 = vmul.f32 %v1635_v47, %v1013_v18 }
 0x266   : > { %v1002_v21 = vmul.f32 2.0, %v961_v17  ;;  %v956_v23 = vadd.f32 %v1628_v42, %v955_v19 }
 0x267   : > { %v1045_v26 = vsel %vm628_vm1, %v1025_v20, 0.0 }
 0x268   : > { %v1010_v24 = vsel %vm986_vm14, %v1002_v21, 0.0  ;;  %v965_v33 = vmax.f32 %v956_v23, 0.0 }
 0x269   : > { %v946_v25 = vpop.f32.mrf.mxu2  ;;  %v1022_v27 = vmul.f32 %v1635_v47, %v1010_v24 }
 0x26a   : > { %v947_v29 = vadd.f32 %v1628_v42, %v946_v25  ;;  %v1006_v37 = vmul.f32 2.0, %v965_v33 }
 0x26b   : > { %v1036_v31 = vsel %vm628_vm1, %v1022_v27, 0.0 }
 0x26c   : > { %v962_v32 = vmax.f32 %v947_v29, 0.0  ;;  %1046 = vadd.xlane.f32.xlu1 %v1045_v26  ;;  %1037 = vadd.xlane.f32.xlu2 %v1036_v31  ;;  %v1014_v46 = vsel %vm998_vm0, %v1006_v37, 0.0 }
 0x26d   : > { %v1026_v48 = vmul.f32 %v1635_v47, %v1014_v46 }
 0x26e   : > { %v1003_v35 = vmul.f32 2.0, %v962_v32 }
 0x26f   : > { %v1048_v53 = vsel %vm628_vm1, %v1026_v48, 0.0 }
 0x270   : > { %v1011_v38 = vsel %vm989_vm15, %v1003_v35, 0.0 }
 0x271   : > { %v949_v39 = vpop.f32.mrf.mxu2  ;;  %v1023_v40 = vmul.f32 %v1635_v47, %v1011_v38 }
 0x272   : > { %v950_v43 = vadd.f32 %v1628_v42, %v949_v39 }
 0x273   : > { %v1039_v44 = vsel %vm628_vm1, %v1023_v40, 0.0 }
 0x274   : > { %v963_v45 = vmax.f32 %v950_v43, 0.0  ;;  %1040 = vadd.xlane.f32.xlu2 %v1039_v44 }
 0x276   : > { %v1004_v49 = vmul.f32 2.0, %v963_v45 }
 0x278   : > { %v1012_v50 = vsel %vm992_vm2, %v1004_v49, 0.0 }
 0x279   : > { %v1024_v51 = vmul.f32 %v1635_v47, %v1012_v50 }
 0x27b   : > { %v1042_v52 = vsel %vm628_vm1, %v1024_v51, 0.0 }
 0x27c   : > { %1043 = vadd.xlane.f32.xlu0 %v1042_v52  ;;  %1049 = vadd.xlane.f32.xlu2 %v1048_v53 }
 0x2c7   : > { %v1029_v42 = vpop.xlane.xlu2 %1028 }
 0x2c8   : > { %v1055_v55 = vadd.f32 %v1298_v54, %v1029_v42 }
 0x2ca   : > { %1064 = vst.msk [vmem:[%s490_s11] sm:$0xff] %vm1063_vm3, %v1055_v55 }
 0x2cf   : > { %v1032_v56 = vpop.xlane.xlu0 %1031 }
 0x2d0   : > { %v1056_v57 = vadd.f32 %v1298_v54, %v1032_v56 }
 0x2d2   : > { %1065 = vst.msk [vmem:[%s490_s11 + $0x8] sm:$0xff] %vm1063_vm3, %v1056_v57 }
 0x2d7   : > { %v1035_v47 = vpop.xlane.xlu1 %1034 }
 0x2d8   : > { %v1057_v58 = vadd.f32 %v1298_v54, %v1035_v47 }
 0x2da   : > { %1066 = vst.msk [vmem:[%s490_s11 + $0x10] sm:$0xff] %vm1063_vm3, %v1057_v58 }
 0x2df   : > { %v1047_v59 = vpop.xlane.xlu1 %1046  ;;  %v1038_v60 = vpop.xlane.xlu2 %1037 }
 0x2e0   : > { %v1061_v61 = vadd.f32 %v1298_v54, %v1047_v59  ;;  %v1058_v62 = vadd.f32 %v1298_v54, %v1038_v60 }
 0x2e2   : > { %1070 = vst.msk [vmem:[%s490_s11 + $0x30] sm:$0xff] %vm1063_vm3, %v1061_v61 }
 0x2e3   : > { %1067 = vst.msk [vmem:[%s490_s11 + $0x18] sm:$0xff] %vm1063_vm3, %v1058_v62 }
 0x2e7   : > { %v1041_v63 = vpop.xlane.xlu2 %1040 }
 0x2e8   : > { %v1059_v0 = vadd.f32 %v1298_v54, %v1041_v63 }
 0x2ea   : > { %1068 = vst.msk [vmem:[%s490_s11 + $0x20] sm:$0xff] %vm1063_vm3, %v1059_v0 }
 0x2ef   : > { %v1044_v1 = vpop.xlane.xlu0 %1043  ;;  %v1050_v2 = vpop.xlane.xlu2 %1049 }
 0x2f0   : > { %v1060_v3 = vadd.f32 %v1298_v54, %v1044_v1  ;;  %v1062_v4 = vadd.f32 %v1298_v54, %v1050_v2 }
 0x2f2   : > { %1069 = vst.msk [vmem:[%s490_s11 + $0x28] sm:$0xff] %vm1063_vm3, %v1060_v3 }
 0x2f3   : > { %1071 = vst.msk [vmem:[%s490_s11 + $0x38] sm:$0xff] %vm1063_vm3, %v1062_v4 }
 0x2f4 PF: > { %p17_p9 = scmp.ge.s32.totalorder %s1389_s10, 4   ;;  %s1699_s29 = smov %s1317_s30 }
 0x2f5   : > { %s1700_s30 = smov %s1398_s13  ;;  %s1701_s9 = smov %s1389_s10 }
 0x2f6   :  { %19 = sbr.rel (!%p17_p9) target bundleno = 5 (0x5), region = 135 }

</bundles_post_ra>
